<compile_context>
chip_gen: v5e
topology: v5e:2x2
jax: 0.10.0
libtpu: 0.0.40
codegen_flags: <defaults>
</compile_context>

<pallas_src>
import jax
import jax.numpy as jnp
from jax import lax
from jax.experimental import pallas as pl
from jax.experimental.pallas import tpu as pltpu


def _round_up(x, m):
    return ((x + m - 1) // m) * m


def _num_tensorcores():
    """Best-effort TensorCore-per-device count (v7x / megacore chips -> 2)."""
    try:
        d = jax.devices()[0]
    except Exception:
        return 1
    for attr in ("num_cores", "core_count"):
        v = getattr(d, attr, None)
        if isinstance(v, int) and v > 0:
            return v
    kind = str(getattr(d, "device_kind", "")).lower()
    if any(tag in kind for tag in ("v4", "v5p", "v7")):
        return 2
    return 1


def _make_kernel(num_hidden_layers, batches_per_step):
    """Fused transposed pixel-MLP over `batches_per_step` images.

    refs = (x_ref, w0T, b0, w1T, b1, ..., wLT, bL, o_ref)
      x_ref : (bpg, K0_pad, HW_pad) bf16   im2col, (features, rows) per batch
      w*T   : (out_ch, in_ch)       bf16   transposed matmul weights
      b*    : (out_ch, 1)           f32    biases (broadcast over lanes)
      o_ref : (bpg, Cout_pad, HW_pad) f32  lane-dense output
    """
    n_hidden_mm = num_hidden_layers - 1  # number of 1x1 hidden convs

    def kernel(x_ref, *refs):
        o_ref = refs[-1]
        w = [r[...] for r in refs[:-1]]          # hoist weight/bias loads

        for b in range(batches_per_step):        # static unrolled (1 or N)
            x_t = x_ref[b]                       # (K0_pad, HW_pad) bf16

            # --- fused kxk conv (single im2col matmul) + ReLU, transposed ---
            h = jnp.dot(w[0], x_t, preferred_element_type=jnp.float32)
            h = jnp.maximum(h + w[1], 0.0)       # full-lane bias add / ReLU

            # --- 1x1 hidden convs + ReLU ---
            idx = 2
            for _ in range(n_hidden_mm):
                h = jnp.dot(w[idx], h.astype(jnp.bfloat16),
                            preferred_element_type=jnp.float32)
                h = jnp.maximum(h + w[idx + 1], 0.0)
                idx += 2

            # --- final 1x1 conv + Tanh (Cout padded to full sublane tile) ---
            out_t = jnp.dot(w[idx], h.astype(jnp.bfloat16),
                            preferred_element_type=jnp.float32)
            o_ref[b] = jnp.tanh(out_t + w[idx + 1])

    return kernel


def _whole_spec(p):
    zeros = (0,) * p.ndim
    return pl.BlockSpec(p.shape, lambda g, _z=zeros: _z)


def autoencoder_regr_forward(x_nchw, params, hidden, reception_field=3):
    """Forward pass matching AutoencoderRegr.forward.

    Args:
      x_nchw: (N, Cin, H, W) float32 input (PyTorch convention).
      params: flat list [w0, b0, w1, b1, ..., wL, bL] in PyTorch layouts:
              w0: (hidden[0], Cin, k, k) (OIHW), wi: (hidden[i], hidden[i-1]),
              wL: (Cout, hidden[-1]), biases shaped (ch,).
      hidden: tuple of hidden widths.
    Returns:
      (N, Cout, H, W) float32 output.
    """
    k = reception_field
    pad = k // 2
    N, Cin, H, W = x_nchw.shape
    Cout = params[-2].shape[0]
    HW = H * W
    K0 = k * k * Cin

    K0_pad = _round_up(K0, 16)        # bf16 sublane tile
    HW_pad = _round_up(HW, 128)       # lane tile
    Cout_pad = _round_up(Cout, 8)     # full f32 sublane tile for the output store

    # ---- glue: im2col directly in the kernel's (N, K0, HW) layout (no transposes) ----
    x_bf = x_nchw.astype(jnp.bfloat16)
    x_pad = jnp.pad(x_bf, ((0, 0), (0, 0), (pad, pad), (pad, pad)))
    cols = jnp.stack([x_pad[:, :, dy:dy + H, dx:dx + W]
                      for dy in range(k) for dx in range(k)], axis=2)  # (N, Cin, k*k, H, W)
    x_cols_t = cols.reshape(N, K0, HW)                                 # feature idx = c*k*k + dy*k + dx
    x_cols_t = jnp.pad(x_cols_t, ((0, 0), (0, K0_pad - K0), (0, HW_pad - HW)))

    # ---- resident parameters: transposed bf16 weights, f32 (ch, 1) biases ----
    hid0 = hidden[0]
    w0_t = jnp.pad(params[0].reshape(hid0, K0), ((0, 0), (0, K0_pad - K0)))
    kparams = [w0_t.astype(jnp.bfloat16),
               params[1].reshape(hid0, 1).astype(jnp.float32)]
    idx = 2
    for _ in range(len(hidden) - 1):
        kparams.append(params[idx].astype(jnp.bfloat16))                       # (out, in)
        kparams.append(params[idx + 1].reshape(-1, 1).astype(jnp.float32))
        idx += 2
    wL_t = jnp.pad(params[idx], ((0, Cout_pad - Cout), (0, 0))).astype(jnp.bfloat16)
    bL = jnp.pad(params[idx + 1].reshape(-1, 1),
                 ((0, Cout_pad - Cout), (0, 0))).astype(jnp.float32)
    kparams += [wL_t, bL]

    # ---- generation-aware grid: 1 big step on single-TC chips, 1 batch/step otherwise ----
    n_cores = _num_tensorcores()
    bpg = N if n_cores <= 1 else 1            # batches per grid step
    grid = (N // bpg,)
    # TODO(synk): if N < n_cores the spare TensorCore idles; could sub-tile HW in that case.

    kernel = _make_kernel(len(hidden), bpg)

    in_specs = [pl.BlockSpec((bpg, K0_pad, HW_pad), lambda g: (g, 0, 0))]
    in_specs += [_whole_spec(p) for p in kparams]
    out_spec = pl.BlockSpec((bpg, Cout_pad, HW_pad), lambda g: (g, 0, 0))

    y = pl.pallas_call(
        kernel,
        out_shape=jax.ShapeDtypeStruct((N, Cout_pad, HW_pad), jnp.float32),
        grid_spec=pltpu.PrefetchScalarGridSpec(
            num_scalar_prefetch=0,
            grid=grid,
            in_specs=in_specs,
            out_specs=out_spec,
        ),
        compiler_params=pltpu.CompilerParams(
            dimension_semantics=("parallel",),
        ),
    )(x_cols_t, *kparams)

    # ---- glue: (N, Cout_pad, HW_pad) -> (N, Cout, H, W); reshape only, no transpose ----
    return y[:, :Cout, :HW].reshape(N, Cout, H, W)


def _init_params(key, in_channels, out_channels, hidden, k):
    """Deterministic synthetic parameters in PyTorch Conv2d layouts."""
    params = []
    keys = jax.random.split(key, 2 * (len(hidden) + 1))
    ki = 0

    # first conv: kxk, in_channels -> hidden[0]   (OIHW)
    params.append(0.1 * jax.random.normal(keys[ki], (hidden[0], in_channels, k, k),
                                          jnp.float32)); ki += 1
    params.append(0.1 * jax.random.normal(keys[ki], (hidden[0],), jnp.float32)); ki += 1

    # 1x1 convs between hidden widths  (out, in)
    for inch, outch in zip(hidden, hidden[1:]):
        params.append(0.1 * jax.random.normal(keys[ki], (outch, inch), jnp.float32)); ki += 1
        params.append(0.1 * jax.random.normal(keys[ki], (outch,), jnp.float32)); ki += 1

    # final 1x1 conv: hidden[-1] -> out_channels
    params.append(0.1 * jax.random.normal(keys[ki], (out_channels, hidden[-1]),
                                          jnp.float32)); ki += 1
    params.append(0.1 * jax.random.normal(keys[ki], (out_channels,), jnp.float32)); ki += 1
    return params


def _reference_forward(x_nchw, params, hidden):
    """Pure-JAX reference (XLA conv / einsum) for correctness checking."""
    y = lax.conv_general_dilated(
        x_nchw, params[0], window_strides=(1, 1), padding='SAME',
        dimension_numbers=('NCHW', 'OIHW', 'NCHW'))
    y = jnp.maximum(y + params[1][None, :, None, None], 0.0)
    idx = 2
    for _ in range(len(hidden) - 1):
        y = jnp.einsum('oc,nchw->nohw', params[idx], y) + params[idx + 1][None, :, None, None]
        y = jnp.maximum(y, 0.0)
        idx += 2
    y = jnp.einsum('oc,nchw->nohw', params[idx], y) + params[idx + 1][None, :, None, None]
    return jnp.tanh(y)


if __name__ == "__main__":
    # config consistent with the module:
    # AutoencoderRegr(in_channels=4, out_channels=3, hidden=(32, 16), reception_field=3)
    in_channels, out_channels = 4, 3
    hidden = (32, 16)
    reception_field = 3
    N, H, W = 2, 16, 16

    key = jax.random.PRNGKey(0)
    kx, kp = jax.random.split(key)
    x = jax.random.normal(kx, (N, in_channels, H, W), jnp.float32)
    params = _init_params(kp, in_channels, out_channels, hidden, reception_field)

    y = autoencoder_regr_forward(x, params, hidden, reception_field)
    y = jax.block_until_ready(y)

    y_ref = jax.block_until_ready(_reference_forward(x, params, hidden))
    assert y.shape == (N, out_channels, H, W)
    # bf16 matmul inputs (f32 accumulation) -> loosened tolerance vs reference
    assert jnp.max(jnp.abs(y - y_ref)) < 3e-2, "mismatch vs reference"

    print("KERNEL_OK")
</pallas_src>

<mosaic_0001>
module attributes {stable_mosaic.version = 11 : i64} {
  func.func @kernel(%arg0: i32, %arg1: memref<2x48x256xbf16, #tpu.memory_space<vmem>>, %arg2: memref<32x48xbf16, #tpu.memory_space<vmem>>, %arg3: memref<32x1xf32, #tpu.memory_space<vmem>>, %arg4: memref<16x32xbf16, #tpu.memory_space<vmem>>, %arg5: memref<16x1xf32, #tpu.memory_space<vmem>>, %arg6: memref<8x16xbf16, #tpu.memory_space<vmem>>, %arg7: memref<8x1xf32, #tpu.memory_space<vmem>>, %arg8: memref<2x8x256xf32, #tpu.memory_space<vmem>>) attributes {dimension_semantics = [#tpu.dimension_semantics<parallel>], iteration_bounds = array<i64: 1>, scalar_prefetch = 0 : i64, scratch_operands = 0 : i64, tpu.core_type = #tpu.core_type<tc>, window_params = [{transform_indices = @transform_0, window_bounds = array<i64: 2, 48, 256>}, {pipeline_mode = #tpu.pipeline_mode<synchronous>, transform_indices = @transform_1, window_bounds = array<i64: 32, 48>}, {pipeline_mode = #tpu.pipeline_mode<synchronous>, transform_indices = @transform_2, window_bounds = array<i64: 32, 1>}, {pipeline_mode = #tpu.pipeline_mode<synchronous>, transform_indices = @transform_3, window_bounds = array<i64: 16, 32>}, {pipeline_mode = #tpu.pipeline_mode<synchronous>, transform_indices = @transform_4, window_bounds = array<i64: 16, 1>}, {pipeline_mode = #tpu.pipeline_mode<synchronous>, transform_indices = @transform_5, window_bounds = array<i64: 8, 16>}, {pipeline_mode = #tpu.pipeline_mode<synchronous>, transform_indices = @transform_6, window_bounds = array<i64: 8, 1>}, {transform_indices = @transform_7, window_bounds = array<i64: 2, 8, 256>}]} {
    %c0 = arith.constant 0 : index
    %c0_0 = arith.constant 0 : index
    %0 = vector.load %arg2[%c0, %c0_0] : memref<32x48xbf16, #tpu.memory_space<vmem>>, vector<32x48xbf16>
    %c0_1 = arith.constant 0 : index
    %c0_2 = arith.constant 0 : index
    %1 = vector.load %arg3[%c0_1, %c0_2] : memref<32x1xf32, #tpu.memory_space<vmem>>, vector<32x1xf32>
    %c0_3 = arith.constant 0 : index
    %c0_4 = arith.constant 0 : index
    %2 = vector.load %arg4[%c0_3, %c0_4] : memref<16x32xbf16, #tpu.memory_space<vmem>>, vector<16x32xbf16>
    %c0_5 = arith.constant 0 : index
    %c0_6 = arith.constant 0 : index
    %3 = vector.load %arg5[%c0_5, %c0_6] : memref<16x1xf32, #tpu.memory_space<vmem>>, vector<16x1xf32>
    %c0_7 = arith.constant 0 : index
    %c0_8 = arith.constant 0 : index
    %4 = vector.load %arg6[%c0_7, %c0_8] : memref<8x16xbf16, #tpu.memory_space<vmem>>, vector<8x16xbf16>
    %c0_9 = arith.constant 0 : index
    %c0_10 = arith.constant 0 : index
    %5 = vector.load %arg7[%c0_9, %c0_10] : memref<8x1xf32, #tpu.memory_space<vmem>>, vector<8x1xf32>
    %c0_11 = arith.constant 0 : index
    %c0_12 = arith.constant 0 : index
    %c0_13 = arith.constant 0 : index
    %6 = vector.load %arg1[%c0_11, %c0_12, %c0_13] : memref<2x48x256xbf16, #tpu.memory_space<vmem>>, vector<1x48x256xbf16>
    %7 = vector.shape_cast %6 : vector<1x48x256xbf16> to vector<48x256xbf16>
    %cst = arith.constant dense<0.000000e+00> : vector<32x256xf32>
    %8 = tpu.matmul %0, %7, %cst {dimension_numbers = #tpu.dot_dimension_numbers<[1], [0], [0], [1], [0, 0, 1, 1], [], []>} : vector<32x48xbf16>, vector<48x256xbf16>, vector<32x256xf32> -> vector<32x256xf32>
    %9 = vector.broadcast %1 : vector<32x1xf32> to vector<32x256xf32>
    %10 = arith.addf %8, %9 : vector<32x256xf32>
    %cst_14 = arith.constant 0.000000e+00 : f32
    %11 = vector.broadcast %cst_14 : f32 to vector<32x256xf32>
    %12 = arith.maximumf %10, %11 : vector<32x256xf32>
    %13 = arith.truncf %12 : vector<32x256xf32> to vector<32x256xbf16>
    %cst_15 = arith.constant dense<0.000000e+00> : vector<16x256xf32>
    %14 = tpu.matmul %2, %13, %cst_15 {dimension_numbers = #tpu.dot_dimension_numbers<[1], [0], [0], [1], [0, 0, 1, 1], [], []>} : vector<16x32xbf16>, vector<32x256xbf16>, vector<16x256xf32> -> vector<16x256xf32>
    %15 = vector.broadcast %3 : vector<16x1xf32> to vector<16x256xf32>
    %16 = arith.addf %14, %15 : vector<16x256xf32>
    %cst_16 = arith.constant 0.000000e+00 : f32
    %17 = vector.broadcast %cst_16 : f32 to vector<16x256xf32>
    %18 = arith.maximumf %16, %17 : vector<16x256xf32>
    %19 = arith.truncf %18 : vector<16x256xf32> to vector<16x256xbf16>
    %cst_17 = arith.constant dense<0.000000e+00> : vector<8x256xf32>
    %20 = tpu.matmul %4, %19, %cst_17 {dimension_numbers = #tpu.dot_dimension_numbers<[1], [0], [0], [1], [0, 0, 1, 1], [], []>} : vector<8x16xbf16>, vector<16x256xbf16>, vector<8x256xf32> -> vector<8x256xf32>
    %21 = vector.broadcast %5 : vector<8x1xf32> to vector<8x256xf32>
    %22 = arith.addf %20, %21 : vector<8x256xf32>
    %23 = math.tanh %22 : vector<8x256xf32>
    %c0_18 = arith.constant 0 : index
    %c0_19 = arith.constant 0 : index
    %c0_20 = arith.constant 0 : index
    %24 = vector.load %arg8[%c0_18, %c0_19, %c0_20] : memref<2x8x256xf32, #tpu.memory_space<vmem>>, vector<1x8x256xf32>
    %25 = vector.shape_cast %24 : vector<1x8x256xf32> to vector<8x256xf32>
    %26 = vector.shape_cast %23 : vector<8x256xf32> to vector<1x8x256xf32>
    tpu.vector_store %arg8[%c0_18, %c0_19, %c0_20], %26 {strides = array<i32>} : memref<2x8x256xf32, #tpu.memory_space<vmem>>, vector<1x8x256xf32>,
    %c1 = arith.constant 1 : index
    %c0_21 = arith.constant 0 : index
    %c0_22 = arith.constant 0 : index
    %27 = vector.load %arg1[%c1, %c0_21, %c0_22] : memref<2x48x256xbf16, #tpu.memory_space<vmem>>, vector<1x48x256xbf16>
    %28 = vector.shape_cast %27 : vector<1x48x256xbf16> to vector<48x256xbf16>
    %cst_23 = arith.constant dense<0.000000e+00> : vector<32x256xf32>
    %29 = tpu.matmul %0, %28, %cst_23 {dimension_numbers = #tpu.dot_dimension_numbers<[1], [0], [0], [1], [0, 0, 1, 1], [], []>} : vector<32x48xbf16>, vector<48x256xbf16>, vector<32x256xf32> -> vector<32x256xf32>
    %30 = vector.broadcast %1 : vector<32x1xf32> to vector<32x256xf32>
    %31 = arith.addf %29, %30 : vector<32x256xf32>
    %cst_24 = arith.constant 0.000000e+00 : f32
    %32 = vector.broadcast %cst_24 : f32 to vector<32x256xf32>
    %33 = arith.maximumf %31, %32 : vector<32x256xf32>
    %34 = arith.truncf %33 : vector<32x256xf32> to vector<32x256xbf16>
    %cst_25 = arith.constant dense<0.000000e+00> : vector<16x256xf32>
    %35 = tpu.matmul %2, %34, %cst_25 {dimension_numbers = #tpu.dot_dimension_numbers<[1], [0], [0], [1], [0, 0, 1, 1], [], []>} : vector<16x32xbf16>, vector<32x256xbf16>, vector<16x256xf32> -> vector<16x256xf32>
    %36 = vector.broadcast %3 : vector<16x1xf32> to vector<16x256xf32>
    %37 = arith.addf %35, %36 : vector<16x256xf32>
    %cst_26 = arith.constant 0.000000e+00 : f32
    %38 = vector.broadcast %cst_26 : f32 to vector<16x256xf32>
    %39 = arith.maximumf %37, %38 : vector<16x256xf32>
    %40 = arith.truncf %39 : vector<16x256xf32> to vector<16x256xbf16>
    %cst_27 = arith.constant dense<0.000000e+00> : vector<8x256xf32>
    %41 = tpu.matmul %4, %40, %cst_27 {dimension_numbers = #tpu.dot_dimension_numbers<[1], [0], [0], [1], [0, 0, 1, 1], [], []>} : vector<8x16xbf16>, vector<16x256xbf16>, vector<8x256xf32> -> vector<8x256xf32>
    %42 = vector.broadcast %5 : vector<8x1xf32> to vector<8x256xf32>
    %43 = arith.addf %41, %42 : vector<8x256xf32>
    %44 = math.tanh %43 : vector<8x256xf32>
    %c1_28 = arith.constant 1 : index
    %c0_29 = arith.constant 0 : index
    %c0_30 = arith.constant 0 : index
    %45 = vector.load %arg8[%c1_28, %c0_29, %c0_30] : memref<2x8x256xf32, #tpu.memory_space<vmem>>, vector<1x8x256xf32>
    %46 = vector.shape_cast %45 : vector<1x8x256xf32> to vector<8x256xf32>
    %47 = vector.shape_cast %44 : vector<8x256xf32> to vector<1x8x256xf32>
    tpu.vector_store %arg8[%c1_28, %c0_29, %c0_30], %47 {strides = array<i32>} : memref<2x8x256xf32, #tpu.memory_space<vmem>>, vector<1x8x256xf32>,
    return
  }
  func.func @transform_0(%arg0: i32) -> (i32, i32, i32) {
    %c0_i32 = arith.constant 0 : i32
    %c0_i32_0 = arith.constant 0 : i32
    %c0_i32_1 = arith.constant 0 : i32
    return %arg0, %c0_i32, %c0_i32_0 : i32, i32, i32
  }
  func.func @transform_1(%arg0: i32) -> (i32, i32) {
    %c0_i32 = arith.constant 0 : i32
    %c0_i32_0 = arith.constant 0 : i32
    %c0_i32_1 = arith.constant 0 : i32
    return %c0_i32, %c0_i32_0 : i32, i32
  }
  func.func @transform_2(%arg0: i32) -> (i32, i32) {
    %c0_i32 = arith.constant 0 : i32
    %c0_i32_0 = arith.constant 0 : i32
    %c0_i32_1 = arith.constant 0 : i32
    return %c0_i32, %c0_i32_0 : i32, i32
  }
  func.func @transform_3(%arg0: i32) -> (i32, i32) {
    %c0_i32 = arith.constant 0 : i32
    %c0_i32_0 = arith.constant 0 : i32
    %c0_i32_1 = arith.constant 0 : i32
    return %c0_i32, %c0_i32_0 : i32, i32
  }
  func.func @transform_4(%arg0: i32) -> (i32, i32) {
    %c0_i32 = arith.constant 0 : i32
    %c0_i32_0 = arith.constant 0 : i32
    %c0_i32_1 = arith.constant 0 : i32
    return %c0_i32, %c0_i32_0 : i32, i32
  }
  func.func @transform_5(%arg0: i32) -> (i32, i32) {
    %c0_i32 = arith.constant 0 : i32
    %c0_i32_0 = arith.constant 0 : i32
    %c0_i32_1 = arith.constant 0 : i32
    return %c0_i32, %c0_i32_0 : i32, i32
  }
  func.func @transform_6(%arg0: i32) -> (i32, i32) {
    %c0_i32 = arith.constant 0 : i32
    %c0_i32_0 = arith.constant 0 : i32
    %c0_i32_1 = arith.constant 0 : i32
    return %c0_i32, %c0_i32_0 : i32, i32
  }
  func.func @transform_7(%arg0: i32) -> (i32, i32, i32) {
    %c0_i32 = arith.constant 0 : i32
    %c0_i32_0 = arith.constant 0 : i32
    %c0_i32_1 = arith.constant 0 : i32
    return %arg0, %c0_i32, %c0_i32_0 : i32, i32, i32
  }
}

</mosaic_0001>

<bundles_post_ra>
// kernel: tpu_custom_call.1
= control target key start
LH: loop header
LB: loop body
LE: loop exit
PB: predicated region body
PF: predicated region fallthrough
CT: control target
= control target key end

     0   :  { %12 = vsyncpa [#allocation3], 0  ;;  %s773_s0 = inlined_call_operand.hbm [shape: bf16[2,48,256], index: 0, kind: input, shape index: {}]   ;;  %s774_s1 = inlined_call_operand.vmem [shape: bf16[32,48], index: 1, kind: input, shape index: {}]   ;;  %s775_s2 = inlined_call_operand.vmem [shape: f32[32,1], index: 2, kind: input, shape index: {}]   ;;  %s776_s3 = inlined_call_operand.vmem [shape: bf16[16,32], index: 3, kind: input, shape index: {}]   ;;  %s777_s4 = inlined_call_operand.vmem [shape: f32[16,1], index: 4, kind: input, shape index: {}]   ;;  %s778_s5 = inlined_call_operand.vmem [shape: bf16[8,16], index: 5, kind: input, shape index: {}]   ;;  %s779_s6 = inlined_call_operand.vmem [shape: f32[8,1], index: 6, kind: input, shape index: {}]   ;;  %s780_s7 = inlined_call_operand.hbm [shape: f32[2,8,256], index: 7, kind: output, shape index: {}]  }
   0x1   :  { %13 = vsyncpa [#allocation4], 0  ;;  %s18_s26 = sshll.u32 %s773_s0, 4  ;;  %s605_s27 = smov [#allocation2]   ;;  %s19_s26 = int_to_ptr.hbm [resolvable:$true] %s18_s26 }
   0x2   :  { %s20_s28 = sshll.u32 %s605_s27, 4  ;;  %s606_s29 = smov 128   ;;  %s21_s28 = int_to_ptr.vmem [resolvable:$true] %s20_s28 }
   0x3   :  { %s607_s30 = smov 8  }
   0x4   :  { %26 = dma.hbm_to_vmem [thread:$0]  %s19_s26, 1536, %s21_s28, [#allocation3], %s606_s29, %s606_s29, %s607_s30  }
   0x5   :  { %601 = dma.done.wait [#allocation3], 1536  }
   0x6   :  { %602 = vsyncadd [#allocation3], 4294965760  ;;  %v608_v0 = vmov 0   ;;  %v470_v1 = vld [vmem:[#allocation2 + $0x20] sm:$0xf]  ;;  %v50_v15 = vld [vmem:[%s775_s2 + $0x10] sm:$0xff] }
   0x7   :  { %543 = vset.pattern.permute.xlu1 %v608_v0  ;;  %542 = vset.pattern.permute.xlu0 %v608_v0  ;;  %v528_v2 = vld [vmem:[#allocation2 + $0x24] sm:$0xf0]  ;;  %v527_v3 = vld [vmem:[#allocation2 + $0x24] sm:$0xf]  ;;  %v472_v5 = vld [vmem:[#allocation2 + $0x28] sm:$0xf0] }
   0x8   :  { %544 = vset.pattern.permute.xlu2 %v608_v0  ;;  %v471_v4 = vor.u32 %v528_v2, %v470_v1  ;;  %v462_v6 = vld [vmem:[#allocation2 + $0x10] sm:$0xf]  ;;  %v526_v7 = vld [vmem:[#allocation2 + $0x14] sm:$0xf0]  ;;  %v475_v8 = vor.u32 %v527_v3, %v472_v5  ;;  %v525_v9 = vld [vmem:[#allocation2 + $0x14] sm:$0xf]  ;;  %76 = vperm.xlu0 %542, %v50_v15  }
   0x9   :  { %v464_v10 = vld [vmem:[#allocation2 + $0x18] sm:$0xf0]  ;;  %v463_v11 = vor.u32 %v526_v7, %v462_v6  ;;  %v454_v12 = vld [vmem:[#allocation2] sm:$0xf]  ;;  %v524_v14 = vld [vmem:[#allocation2 + $0x4] sm:$0xf0] }
   0xa   :  { %136 = vmatpush.bf16.msra.mxu0 %v471_v4  ;;  %155 = vmatpush.bf16.msra.mxu1 %v475_v8  ;;  %v467_v13 = vor.u32 %v525_v9, %v464_v10  ;;  %v48_v16 = vld [vmem:[%s775_s2] sm:$0xff]  ;;  %v456_v18 = vld [vmem:[#allocation2 + $0x8] sm:$0xf0]  ;;  %v455_v19 = vor.u32 %v524_v14, %v454_v12  ;;  %v51_v22 = vld [vmem:[%s775_s2 + $0x18] sm:$0xff]  ;;  %vm124_vm0 = vcmask 392192   ;;  %vm196_vm1 = vcmask 261120  }
   0xb   :  { %v523_v17 = vld [vmem:[#allocation2 + $0x4] sm:$0xf]  ;;  %66 = vperm.xlu1 %543, %v48_v16   ;;  %v49_v23 = vld [vmem:[%s775_s2 + $0x8] sm:$0xff]  ;;  %v506_v6 = vld [vmem:[#allocation2 + $0x50] sm:$0xf]  ;;  %vm239_vm2 = vcmask 130048  }
   0xc   :  { %v459_v20 = vor.u32 %v523_v17, %v456_v18  ;;  %v664_v21 = vld [vmem:[%s774_s1] sm:$0xff]  ;;  %v682_v25 = vld [vmem:[%s774_s1 + $0x8] sm:$0xff]  ;;  %v534_v7 = vld [vmem:[#allocation2 + $0x54] sm:$0xf0]  ;;  %s431_s27 = sshll.u32 %s780_s7, 4  ;;  %s610_s28 = smov 256   ;;  %s432_s27 = int_to_ptr.hbm [resolvable:$true] %s431_s27 }
   0xd   :  { %v57_v24 = vld [vmem:[%s779_s6] sm:$0xff]  ;;  %v55_v32 = vld [vmem:[%s777_s4 + $0x8] sm:$0xff]  ;;  %v533_v9 = vld [vmem:[#allocation2 + $0x54] sm:$0xf]  ;;  %v507_v15 = vor.u32 %v534_v7, %v506_v6  ;;  %s611_s29 = smov 16  }
   0xe   :  { %137 = vmatpush.bf16.msra.mxu0 %v463_v11  ;;  %156 = vmatpush.bf16.msra.mxu1 %v467_v13  ;;  %v54_v28 = vld [vmem:[%s777_s4] sm:$0xff]  ;;  %v508_v10 = vld [vmem:[#allocation2 + $0x58] sm:$0xf0] }
   0xf   :  { %183 = vperm.xlu2 %544, %v54_v28   ;;  %v713_v60 = vld [vmem:[%s776_s3] sm:$0xff]  ;;  %v511_v17 = vor.u32 %v533_v9, %v508_v10  ;;  %v490_v28 = vld [vmem:[#allocation2 + $0x30] sm:$0xf] }
  0x10   :  { %81 = vperm.xlu0 %542, %v51_v22   ;;  %v498_v18 = vld [vmem:[#allocation2 + $0x40] sm:$0xf]  ;;  %v531_v22 = vld [vmem:[#allocation2 + $0x44] sm:$0xf] }
  0x12   :  { %138 = vmatpush.bf16.msra.mxu0 %v455_v19  ;;  %157 = vmatpush.bf16.msra.mxu1 %v459_v20  ;;  %v532_v19 = vld [vmem:[#allocation2 + $0x44] sm:$0xf0] }
  0x13   :  { %71 = vperm.xlu1 %543, %v49_v23   ;;  %v500_v23 = vld [vmem:[#allocation2 + $0x48] sm:$0xf0] }
  0x15   :  { %476 = vmatmul.msk.bf16.vlgmr.msra.gmra.mxu0 %vm124_vm0, %v664_v21  ;;  %478 = vmatmul.msk.bf16.vlgmr.msra.gmra.mxu1 %vm124_vm0, %v664_v21 }
  0x17   :  { %188 = vperm.xlu2 %544, %v55_v32   ;;  %v492_v32 = vld [vmem:[#allocation2 + $0x38] sm:$0xf0] }
  0x18   :  { %236 = vperm.xlu0 %542, %v57_v24   ;;  %v730_v24 = vld [vmem:[%s778_s5] sm:$0xf]  ;;  %s609_s5 = smov [#allocation5]  }
  0x19   :  { %s429_s24 = sshll.u32 %s609_s5, 4  ;;  %s430_s24 = int_to_ptr.vmem [resolvable:$true] %s429_s24 }
  0x25   :  { %477 = vmatmul.msk.bf16.gmra.mxu0 %vm124_vm0, %v682_v25  ;;  %479 = vmatmul.msk.bf16.gmra.mxu1 %vm124_vm0, %v682_v25 }
  0x69   :  { %v719_v61 = vpop.permute.xlu2 %183 }
  0x71   :  { %v722_v1 = vpop.permute.xlu2 %188 }
  0x7a   :  { %v696_v33 = vpop.permute.xlu0 %76 }
  0x7d   :  { %v691_v31 = vpop.permute.xlu1 %66 }
  0x82   :  { %v701_v38 = vpop.permute.xlu0 %81 }
  0x85   :  { %v698_v36 = vpop.permute.xlu1 %71 }
  0x92   :  { %v140_v26 = vpop.f32.mrf.mxu0  ;;  %v159_v27 = vpop.f32.mrf.mxu1 }
  0x93   :  { %v141_v46 = vadd.f32 %v140_v26, %v691_v31  ;;  %v160_v49 = vadd.f32 %v159_v27, %v691_v31  ;;  %v499_v26 = vor.u32 %v532_v19, %v498_v18  ;;  %v503_v27 = vor.u32 %v531_v22, %v500_v23 }
  0x95   :  { %v169_v56 = vmax.f32 %v141_v46, 0.0  ;;  %v170_v57 = vmax.f32 %v160_v49, 0.0 }
  0x9a   :  { %v142_v29 = vpop.f32.mrf.mxu0  ;;  %v161_v30 = vpop.f32.mrf.mxu1 }
  0x9b   :  { %v143_v41 = vadd.f32 %v142_v29, %v698_v36  ;;  %v162_v44 = vadd.f32 %v161_v30, %v698_v36  ;;  %v530_v29 = vld [vmem:[#allocation2 + $0x34] sm:$0xf0]  ;;  %v529_v30 = vld [vmem:[#allocation2 + $0x34] sm:$0xf] }
  0x9d   :  { %v171_v52 = vmax.f32 %v143_v41, 0.0  ;;  %v172_v54 = vmax.f32 %v162_v44, 0.0 }
  0x9f   :  { %v177_v58 = vpack.c.bf16 %v171_v52, %v169_v56  ;;  %v178_v59 = vpack.c.bf16 %v172_v54, %v170_v57 }
  0xa2   :  { %v145_v34 = vpop.f32.mrf.mxu0  ;;  %v164_v35 = vpop.f32.mrf.mxu1 }
  0xa3   :  { %v146_v37 = vadd.f32 %v145_v34, %v696_v33  ;;  %v165_v39 = vadd.f32 %v164_v35, %v696_v33  ;;  %v491_v34 = vor.u32 %v530_v29, %v490_v28  ;;  %v495_v35 = vor.u32 %v529_v30, %v492_v32 }
  0xa5   :  { %v173_v47 = vmax.f32 %v146_v37, 0.0  ;;  %v174_v50 = vmax.f32 %v165_v39, 0.0  ;;  %v744_v37 = vpop.permute.xlu0 %236 }
  0xaa   :  { %v147_v40 = vpop.f32.mrf.mxu0  ;;  %v166_v43 = vpop.f32.mrf.mxu1 }
  0xab   :  { %v148_v42 = vadd.f32 %v147_v40, %v701_v38  ;;  %v167_v45 = vadd.f32 %v166_v43, %v701_v38 }
  0xad   :  { %v175_v48 = vmax.f32 %v148_v42, 0.0  ;;  %v176_v51 = vmax.f32 %v167_v45, 0.0 }
  0xaf   :  { %v179_v53 = vpack.c.bf16 %v175_v48, %v173_v47  ;;  %v180_v55 = vpack.c.bf16 %v176_v51, %v174_v50 }
  0xb1   :  { %206 = vmatpush.bf16.msra.mxu2 %v179_v53  ;;  %220 = vmatpush.bf16.msra.mxu3 %v180_v55 }
  0xb5   :  { %207 = vmatpush.bf16.msra.mxu2 %v177_v58  ;;  %221 = vmatpush.bf16.msra.mxu3 %v178_v59 }
  0xb8   :  { %484 = vmatmul.msk.bf16.vlgmr.msra.gmra.mxu2 %vm196_vm1, %v713_v60  ;;  %485 = vmatmul.msk.bf16.vlgmr.msra.gmra.mxu3 %vm196_vm1, %v713_v60 }
 0x13b   :  { %v209_v62 = vpop.f32.mrf.mxu2  ;;  %v223_v63 = vpop.f32.mrf.mxu3 }
 0x13c   :  { %v210_v0 = vadd.f32 %v209_v62, %v719_v61  ;;  %v224_v2 = vadd.f32 %v223_v63, %v719_v61 }
 0x13e   :  { %v228_v11 = vmax.f32 %v210_v0, 0.0  ;;  %v229_v13 = vmax.f32 %v224_v2, 0.0 }
 0x143   :  { %v211_v3 = vpop.f32.mrf.mxu2  ;;  %v225_v5 = vpop.f32.mrf.mxu3 }
 0x144   :  { %v212_v4 = vadd.f32 %v211_v3, %v722_v1  ;;  %v226_v8 = vadd.f32 %v225_v5, %v722_v1 }
 0x146   :  { %v230_v12 = vmax.f32 %v212_v4, 0.0  ;;  %v231_v14 = vmax.f32 %v226_v8, 0.0 }
 0x148   :  { %v232_v16 = vpack.c.bf16 %v230_v12, %v228_v11  ;;  %v233_v20 = vpack.c.bf16 %v231_v14, %v229_v13 }
 0x14a   :  { %250 = vmatpush.bf16.msrb.mxu2 %v232_v16  ;;  %263 = vmatpush.bf16.msrb.mxu3 %v233_v20 }
 0x14d   :  { %486 = vmatmul.msk.bf16.vlgmr.msrb.gmra.mxu2 %vm239_vm2, %v730_v24  ;;  %487 = vmatmul.msk.bf16.vlgmr.msrb.gmra.mxu3 %vm239_vm2, %v730_v24 }
 0x14e   :  { %315 = vmatpush.bf16.msra.mxu2 %v507_v15  ;;  %334 = vmatpush.bf16.msra.mxu3 %v511_v17 }
 0x152   :  { %316 = vmatpush.bf16.msra.mxu2 %v499_v26  ;;  %335 = vmatpush.bf16.msra.mxu3 %v503_v27 }
 0x156   :  { %317 = vmatpush.bf16.msra.mxu2 %v491_v34  ;;  %336 = vmatpush.bf16.msra.mxu3 %v495_v35 }
 0x15d   :  { %512 = vmatmul.msk.bf16.vlgmr.msra.gmra.mxu2 %vm124_vm0, %v664_v21  ;;  %514 = vmatmul.msk.bf16.vlgmr.msra.gmra.mxu3 %vm124_vm0, %v664_v21 }
 0x16d   :  { %513 = vmatmul.msk.bf16.gmra.mxu2 %vm124_vm0, %v682_v25  ;;  %515 = vmatmul.msk.bf16.gmra.mxu3 %vm124_vm0, %v682_v25 }
 0x1d0   :  { %v252_v39 = vpop.f32.mrf.mxu2  ;;  %v265_v41 = vpop.f32.mrf.mxu3 }
 0x1d1   :  { %v253_v40 = vadd.f32 %v252_v39, %v744_v37  ;;  %v266_v42 = vadd.f32 %v265_v41, %v744_v37 }
 0x1d3   :  { %545 = vtanh.f32 %v253_v40 }
 0x1d4   :  { %547 = vtanh.f32 %v266_v42 }
 0x1d8   :  { %v254_v43 = vpop.f32.mrf.mxu2  ;;  %v267_v45 = vpop.f32.mrf.mxu3 }
 0x1d9   :  { %v546_v44 = vpop.eup %545 }
 0x1da   :  { %v548_v21 = vpop.eup %547  ;;  %271 = vst [vmem:[#allocation5] sm:$0xff] %v546_v44 }
 0x1db   :  { %272 = vst [vmem:[#allocation5 + $0x8] sm:$0xff] %v548_v21 }
 0x1e0   :  { %v319_v46 = vpop.f32.mrf.mxu2  ;;  %v338_v47 = vpop.f32.mrf.mxu3 }
 0x1e1   :  { %v320_v59 = vadd.f32 %v319_v46, %v691_v31  ;;  %v339_v0 = vadd.f32 %v338_v47, %v691_v31 }
 0x1e3   :  { %v348_v7 = vmax.f32 %v320_v59, 0.0  ;;  %v349_v8 = vmax.f32 %v339_v0, 0.0 }
 0x1e8   :  { %v321_v48 = vpop.f32.mrf.mxu2  ;;  %v340_v25 = vpop.f32.mrf.mxu3 }
 0x1e9   :  { %v322_v54 = vadd.f32 %v321_v48, %v698_v36  ;;  %v341_v57 = vadd.f32 %v340_v25, %v698_v36 }
 0x1eb   :  { %v350_v4 = vmax.f32 %v322_v54, 0.0  ;;  %v351_v5 = vmax.f32 %v341_v57, 0.0 }
 0x1ed   :  { %v356_v9 = vpack.c.bf16 %v350_v4, %v348_v7  ;;  %v357_v36 = vpack.c.bf16 %v351_v5, %v349_v8 }
 0x1f0   :  { %v324_v49 = vpop.f32.mrf.mxu2  ;;  %v343_v50 = vpop.f32.mrf.mxu3 }
 0x1f1   :  { %v325_v51 = vadd.f32 %v324_v49, %v696_v33  ;;  %v344_v52 = vadd.f32 %v343_v50, %v696_v33 }
 0x1f3   :  { %v352_v62 = vmax.f32 %v325_v51, 0.0  ;;  %v353_v2 = vmax.f32 %v344_v52, 0.0 }
 0x1f8   :  { %v326_v53 = vpop.f32.mrf.mxu2  ;;  %v345_v56 = vpop.f32.mrf.mxu3 }
 0x1f9   :  { %v327_v55 = vadd.f32 %v326_v53, %v701_v38  ;;  %v346_v58 = vadd.f32 %v345_v56, %v701_v38 }
 0x1fb   :  { %v354_v63 = vmax.f32 %v327_v55, 0.0  ;;  %v355_v3 = vmax.f32 %v346_v58, 0.0 }
 0x1fd   :  { %v358_v33 = vpack.c.bf16 %v354_v63, %v352_v62  ;;  %v359_v6 = vpack.c.bf16 %v355_v3, %v353_v2 }
 0x1ff   :  { %366 = vmatpush.bf16.msrb.mxu0 %v358_v33  ;;  %380 = vmatpush.bf16.msrb.mxu1 %v359_v6 }
 0x203   :  { %367 = vmatpush.bf16.msrb.mxu0 %v356_v9  ;;  %381 = vmatpush.bf16.msrb.mxu1 %v357_v36 }
 0x206   :  { %516 = vmatmul.msk.bf16.vlgmr.msrb.gmra.mxu0 %vm196_vm1, %v713_v60  ;;  %517 = vmatmul.msk.bf16.vlgmr.msrb.gmra.mxu1 %vm196_vm1, %v713_v60 }
 0x283   :  { %v369_v31 = vpop.f32.mrf.mxu0  ;;  %v383_v38 = vpop.f32.mrf.mxu1 }
 0x284   :  { %v370_v10 = vadd.f32 %v369_v31, %v719_v61  ;;  %v384_v11 = vadd.f32 %v383_v38, %v719_v61 }
 0x286   :  { %v388_v16 = vmax.f32 %v370_v10, 0.0  ;;  %v389_v18 = vmax.f32 %v384_v11, 0.0 }
 0x28b   :  { %v371_v12 = vpop.f32.mrf.mxu0  ;;  %v385_v14 = vpop.f32.mrf.mxu1 }
 0x28c   :  { %v372_v13 = vadd.f32 %v371_v12, %v722_v1  ;;  %v386_v15 = vadd.f32 %v385_v14, %v722_v1 }
 0x28e   :  { %v390_v17 = vmax.f32 %v372_v13, 0.0  ;;  %v391_v19 = vmax.f32 %v386_v15, 0.0 }
 0x290   :  { %v392_v20 = vpack.c.bf16 %v390_v17, %v388_v16  ;;  %v393_v22 = vpack.c.bf16 %v391_v19, %v389_v18 }
 0x292   :  { %401 = vmatpush.bf16.msra.mxu0 %v392_v20  ;;  %414 = vmatpush.bf16.msra.mxu1 %v393_v22 }
 0x295   :  { %518 = vmatmul.msk.bf16.vlgmr.msra.gmra.mxu0 %vm239_vm2, %v730_v24  ;;  %519 = vmatmul.msk.bf16.vlgmr.msra.gmra.mxu1 %vm239_vm2, %v730_v24 }
 0x312   :  { %v403_v60 = vpop.f32.mrf.mxu0  ;;  %v416_v23 = vpop.f32.mrf.mxu1 }
 0x313   :  { %v404_v61 = vadd.f32 %v403_v60, %v744_v37  ;;  %v417_v1 = vadd.f32 %v416_v23, %v744_v37 }
 0x315   :  { %549 = vtanh.f32 %v404_v61 }
 0x316   :  { %551 = vtanh.f32 %v417_v1 }
 0x31a   :  { %v405_v26 = vpop.f32.mrf.mxu0  ;;  %v418_v28 = vpop.f32.mrf.mxu1 }
 0x31b   :  { %v550_v27 = vpop.eup %549 }
 0x31c   :  { %v552_v24 = vpop.eup %551  ;;  %423 = vst [vmem:[#allocation5 + $0x10] sm:$0xff] %v550_v27 }
 0x31d   :  { %424 = vst [vmem:[#allocation5 + $0x18] sm:$0xff] %v552_v24 }
 0x31e   :  { %437 = dma.vmem_to_hbm [thread:$0]  %s430_s24, 512, %s432_s27, [#allocation4], %s610_s28, %s610_s28, %s611_s29  }
 0x31f   :  { %603 = dma.done.wait [#allocation4], 512  }
 0x320   :  { %604 = vsyncadd [#allocation4], 4294966784 }
 0x321   :  { %442 = vsyncpa [#allocation3], 1 }
 0x322   :  { %443 = vsyncpa [#allocation4], 1 }

</bundles_post_ra>
